<compile_context>
chip_gen: v6e
topology: v6e:2x2x1
jax: 0.10.0
libtpu: 0.0.40
codegen_flags: <defaults>
</compile_context>

<pallas_src>
import numpy as np
import jax
import jax.numpy as jnp
from jax.experimental import pallas as pl
from jax.experimental.pallas import tpu as pltpu

_MiB = 1024 * 1024


def _vmem_capacity_bytes():
    """Physical per-core VMEM (falls back to the smallest current part, v7x = 64 MiB)."""
    try:
        cap = getattr(pltpu.get_tpu_info(), "vmem_capacity_bytes", None)
        if cap:
            return int(cap)
    except Exception:
        pass
    return 64 * _MiB


def _num_tensorcores():
    """2 only on chips with two TensorCores per chip (v7x); v5e/v6e have one."""
    try:
        kind = jax.devices()[0].device_kind.lower()
    except Exception:
        return 1
    return 2 if any(tag in kind for tag in ("v7", "tpu7", "7x")) else 1


def _sublane_multiple(itemsize):
    # Packed sublane tile: 8 rows for f32, 16 for bf16, 32 for int8/fp8.
    return max(8, 32 // max(1, int(itemsize)))


def _choose_layout(T, C, itemsize, block_bytes_cap):
    """Pick k (timesteps packed per row, k | T) so L = k*C is as lane-dense as possible.

    Preference: the smallest divisor k of T with (k*C) % 128 == 0 (fully unmasked
    128-lane vld/vst); otherwise the k maximizing L / (128*ceil(L/128)).  k is capped so
    at least one sublane-tile of rows still fits the per-pass block byte budget.
    """
    sub = _sublane_multiple(itemsize)
    best_k, best_key = 1, None
    for k in range(1, T + 1):
        if T % k:
            continue
        L = k * C
        if k > 1 and L * itemsize * sub > block_bytes_cap:
            break                                    # rows too long for the tile budget
        density = L / (128.0 * ((L + 127) // 128))
        key = (L % 128 == 0, density, -k)
        if best_key is None or key > best_key:
            best_key, best_k = key, k
        if L % 128 == 0:
            break                                    # smallest perfect k; done
    k = best_k
    return k, T // k, k * C, sub


def _row_tile(R, L, itemsize, sub, block_bytes):
    """Largest row tile (multiple of the dtype's sublane tile) fitting block_bytes."""
    rt = max(sub, (block_bytes // max(1, itemsize * L)) // sub * sub)
    return R if rt >= R else rt


# --------------------------------------------------------------------------- fused path
def _fused_centralize(x2, lengths, bias_f, T, B, F, vmem_limit):
    """Single-dispatch path: whole tensor resident in VMEM, 2x HBM traffic (read+write)."""
    CB = B * F

    def kernel(lens_ref, bias_ref, x_ref, o_ref):
        # lens_ref: SMEM (B,) int32 (scalar prefetch); bias_ref: (1, F) f32;
        # x_ref / o_ref: (T, B*F), columns grouped as [b0 feats | b1 feats | ...].
        t_idx = jax.lax.broadcasted_iota(jnp.int32, (T, 1), 0)
        s = jnp.zeros((1, F), jnp.float32)
        count = jnp.zeros((), jnp.int32)
        for b in range(B):                       # B is small on this path; unrolled
            lb = jnp.clip(lens_ref[b], 0, T)
            xb = x_ref[:, b * F:(b + 1) * F].astype(jnp.float32)        # (T, F)
            s = s + jnp.sum(jnp.where(t_idx < lb, xb, 0.0), axis=0, keepdims=True)
            count = count + lb
        mean = s / jnp.maximum(count, 1).astype(jnp.float32)            # (1, F)
        diff = bias_ref[...] - mean                                     # (1, F)
        for b in range(B):
            xb = x_ref[:, b * F:(b + 1) * F].astype(jnp.float32)
            o_ref[:, b * F:(b + 1) * F] = (xb + diff).astype(o_ref.dtype)

    return pl.pallas_call(
        kernel,
        out_shape=jax.ShapeDtypeStruct((T, CB), x2.dtype),
        grid_spec=pltpu.PrefetchScalarGridSpec(
            num_scalar_prefetch=1,
            grid=(1,),
            in_specs=[
                pl.BlockSpec((1, F), lambda i, lens: (0, 0)),           # bias (f32)
                pl.BlockSpec((T, CB), lambda i, lens: (0, 0)),          # x, fully resident
            ],
            out_specs=pl.BlockSpec((T, CB), lambda i, lens: (0, 0)),
        ),
        compiler_params=pltpu.CompilerParams(
            dimension_semantics=("arbitrary",),
            vmem_limit_bytes=vmem_limit,
        ),
    )(lengths, bias_f.reshape(1, F), x2)


# ------------------------------------------------------------------------ two-pass path
def _masked_sums(x2, col_thresh, R, L, RT, k, ncores, vmem_limit):
    total_tiles = -(-R // RT)
    tiles_per_core = -(-total_tiles // ncores)

    def kernel(thresh_ref, x_ref, psum_ref):
        core = pl.program_id(0)
        step = pl.program_id(1)

        @pl.when(step == 0)
        def _():
            psum_ref[...] = jnp.zeros_like(psum_ref)

        # Logical tile index.  When total_tiles is odd on the 2-core split, the clamped
        # index_map re-fetches the last tile on the second core; its rows map to t >= T,
        # so the mask below zeroes every contribution (correct; tiny, v7x-only waste).
        tile = core * tiles_per_core + step
        rows = tile * RT + jax.lax.broadcasted_iota(jnp.int32, (RT, 1), 0)
        mask = (rows * k) < thresh_ref[...]                      # (RT, L)
        xv = x_ref[...].astype(jnp.float32)
        partial = jnp.sum(jnp.where(mask, xv, 0.0), axis=0)      # (L,)  select, not mul
        psum_ref[...] += partial.reshape(1, 1, L)

    return pl.pallas_call(
        kernel,
        out_shape=jax.ShapeDtypeStruct((ncores, 1, L), jnp.float32),
        grid=(ncores, tiles_per_core),
        in_specs=[
            pl.BlockSpec((1, L), lambda c, s: (0, 0)),
            pl.BlockSpec(
                (RT, L),
                lambda c, s: (jnp.minimum(c * tiles_per_core + s, total_tiles - 1), 0),
            ),
        ],
        out_specs=pl.BlockSpec((1, 1, L), lambda c, s: (c, 0, 0)),
        compiler_params=pltpu.CompilerParams(
            dimension_semantics=("parallel", "arbitrary"),
            vmem_limit_bytes=vmem_limit,
        ),
    )(col_thresh, x2)


def _center(x2, col_diff, R, L, RT, vmem_limit, donate):
    total_tiles = -(-R // RT)

    def kernel(diff_ref, x_ref, o_ref):
        o_ref[...] = (x_ref[...].astype(jnp.float32) + diff_ref[...]).astype(o_ref.dtype)

    return pl.pallas_call(
        kernel,
        out_shape=jax.ShapeDtypeStruct((R, L), x2.dtype),
        grid=(total_tiles,),
        in_specs=[
            pl.BlockSpec((1, L), lambda i: (0, 0)),
            pl.BlockSpec((RT, L), lambda i: (i, 0)),
        ],
        out_specs=pl.BlockSpec((RT, L), lambda i: (i, 0)),
        compiler_params=pltpu.CompilerParams(
            dimension_semantics=("parallel",),      # independent tiles; megacore-shardable
            vmem_limit_bytes=vmem_limit,
        ),
        input_output_aliases=({1: 0} if donate else {}),
    )(col_diff, x2)


# ----------------------------------------------------------------------------- wrapper
def seq_batch_centralization(x, sent_length, bias, mean=None, *,
                             allow_fused=True, donate_x=False,
                             sum_block_bytes=8 * _MiB,
                             center_block_bytes=4 * _MiB):
    """Pallas implementation of SeqBatchCentralization.forward.

    x:           (T, B, *num_features) float array
    sent_length: (B,) integer valid lengths per batch element
    bias:        (*num_features,) 'bias' parameter of the module
    mean:        optional (*num_features,). If given, the batch-statistics pass is
                 skipped (eval / running_mean path: output = x + bias - mean).
    donate_x:    alias x's buffer to the centering output (only if the caller can
                 donate x; avoids a second full-size HBM allocation).
    """
    orig_shape = x.shape
    T, B = int(orig_shape[0]), int(orig_shape[1])
    feat_shape = orig_shape[2:]
    F = int(np.prod(feat_shape)) if feat_shape else 1
    C = B * F
    itemsize = int(x.dtype.itemsize)

    lengths = jnp.asarray(sent_length, jnp.int32)
    bias_f = jnp.asarray(bias, jnp.float32).reshape(F)

    vmem_cap = _vmem_capacity_bytes()
    two_pass_vmem_limit = min(40 * _MiB, (3 * vmem_cap) // 4)

    # ---- Fused single-dispatch path (small inputs): 2x HBM traffic instead of 3x ----
    x_f32_bytes = T * C * 4
    if (mean is None and allow_fused and B <= 64
            and x_f32_bytes <= min(8 * _MiB, vmem_cap // 16)):
        out2 = _fused_centralize(x.reshape(T, C), lengths, bias_f, T, B, F,
                                 vmem_limit=min((3 * vmem_cap) // 4, 96 * _MiB))
        return out2.reshape(orig_shape)

    # ---- Tiled two-pass path on a lane-dense (R, L) view (free row-major reshape) ----
    k, R, L, sub = _choose_layout(T, C, itemsize,
                                  min(sum_block_bytes, center_block_bytes))
    x2 = x.reshape(R, L)
    # Clamp matches a mask built from arange(T) < sent_length (generateMask semantics).
    lengths_c = jnp.clip(lengths, 0, T)

    if mean is None:
        # Column j of the (R, L) view holds (t = r*k + j//C, b = (j//F) % B, f = j % F):
        # row r is valid for column j iff r*k < lengths[b] - j//C.
        j = jnp.arange(L, dtype=jnp.int32)
        col_thresh = (lengths_c[(j // F) % B] - (j // C)).reshape(1, L)

        RT1 = _row_tile(R, L, itemsize, sub, sum_block_bytes)
        total_tiles1 = -(-R // RT1)
        ncores = _num_tensorcores()
        if total_tiles1 < 2 * ncores:            # too few tiles to be worth splitting
            ncores = 1
        psums = _masked_sums(x2, col_thresh, R, L, RT1, k, ncores, two_pass_vmem_limit)

        sums = psums.sum(axis=(0, 1)).reshape(k * B, F).sum(axis=0)       # (F,) per feat
        count = jnp.maximum(jnp.sum(lengths_c), 1).astype(jnp.float32)    # all-zero guard
        mean_f = sums / count
    else:
        mean_f = jnp.asarray(mean, jnp.float32).reshape(F)

    diff = bias_f - mean_f
    col_diff = jnp.tile(diff, k * B).reshape(1, L)                        # per-column shift

    RT2 = _row_tile(R, L, itemsize, sub, center_block_bytes)
    out2 = _center(x2, col_diff, R, L, RT2, two_pass_vmem_limit, donate_x)
    return out2.reshape(orig_shape)


# --------------------------------------------------------------------------- reference
def _reference(x, lengths, bias):
    x = np.asarray(x, dtype=np.float64)
    T = x.shape[0]
    lengths = np.clip(np.asarray(lengths), 0, T)
    mask = (np.arange(T)[:, None] < lengths[None, :]).astype(np.float64)   # (T, B)
    mexp = mask.reshape(mask.shape + (1,) * (x.ndim - 2))
    denom = max(mask.sum(), 1.0)
    mean = (x * mexp).sum(axis=(0, 1)) / denom
    return x + (np.asarray(bias, dtype=np.float64) - mean)


if __name__ == "__main__":
    key = jax.random.PRNGKey(0)
    ks = jax.random.split(key, 8)

    # --- Case 1: small canonical shapes -> fused single-dispatch path ---
    T, B, F = 8, 2, 32
    x = jax.random.normal(ks[0], (T, B, F), dtype=jnp.float32)
    lengths = jnp.array([8, 5], dtype=jnp.int32)
    bias = 0.1 * jax.random.normal(ks[1], (F,), dtype=jnp.float32)

    out = jax.block_until_ready(seq_batch_centralization(x, lengths, bias))
    np.testing.assert_allclose(np.asarray(out), _reference(x, lengths, bias),
                               rtol=1e-4, atol=1e-4)

    # Eval / running-mean path: output is just input + (bias - mean).
    out_eval = jax.block_until_ready(
        seq_batch_centralization(x, lengths, bias, mean=jnp.zeros((F,), jnp.float32)))
    np.testing.assert_allclose(np.asarray(out_eval),
                               np.asarray(x) + np.asarray(bias)[None, None, :],
                               rtol=1e-5, atol=1e-5)

    # Same data through the tiled two-pass path (forced) must agree with the fused path.
    out_tp = jax.block_until_ready(
        seq_batch_centralization(x, lengths, bias, allow_fused=False,
                                 sum_block_bytes=8192, center_block_bytes=8192))
    np.testing.assert_allclose(np.asarray(out_tp), np.asarray(out), rtol=1e-5, atol=1e-5)

    # --- Case 2: ragged tiling stress (odd sizes, zero / over-long lengths) ---
    T2, B2, F2 = 37, 3, 24
    x2 = jax.random.normal(ks[2], (T2, B2, F2), dtype=jnp.float32)
    lengths2 = jnp.array([42, 20, 0], dtype=jnp.int32)   # 42 > T2 clipped; 0 tests guard
    bias2 = 0.1 * jax.random.normal(ks[3], (F2,), dtype=jnp.float32)
    out2 = jax.block_until_ready(
        seq_batch_centralization(x2, lengths2, bias2, allow_fused=False,
                                 sum_block_bytes=4096, center_block_bytes=4096))
    np.testing.assert_allclose(np.asarray(out2), _reference(x2, lengths2, bias2),
                               rtol=1e-4, atol=1e-4)

    # --- Case 3: lane-packing k > 1 (k | T chosen so L % 128 == 0), multi-tile grid ---
    T3, B3, F3 = 256, 3, 24                              # C = 72 -> k = 16, L = 1152
    x3 = jax.random.normal(ks[4], (T3, B3, F3), dtype=jnp.float32)
    lengths3 = jnp.array([256, 100, 3], dtype=jnp.int32)
    bias3 = 0.1 * jax.random.normal(ks[5], (F3,), dtype=jnp.float32)
    out3 = jax.block_until_ready(
        seq_batch_centralization(x3, lengths3, bias3, allow_fused=False,
                                 sum_block_bytes=64 * 1024, center_block_bytes=64 * 1024))
    np.testing.assert_allclose(np.asarray(out3), _reference(x3, lengths3, bias3),
                               rtol=1e-4, atol=1e-4)

    # --- Case 4: bf16 through both the fused path and the dtype-aware tiled path ---
    T4, B4, F4 = 64, 4, 32
    x4 = jax.random.normal(ks[6], (T4, B4, F4), dtype=jnp.float32).astype(jnp.bfloat16)
    lengths4 = jnp.array([64, 10, 0, 33], dtype=jnp.int32)
    bias4 = 0.1 * jax.random.normal(ks[7], (F4,), dtype=jnp.float32)
    ref4 = _reference(np.asarray(x4.astype(jnp.float32)), lengths4, bias4)

    out4_f = jax.block_until_ready(seq_batch_centralization(x4, lengths4, bias4))
    np.testing.assert_allclose(np.asarray(out4_f.astype(jnp.float32)), ref4,
                               rtol=3e-2, atol=3e-2)
    out4_t = jax.block_until_ready(
        seq_batch_centralization(x4, lengths4, bias4, allow_fused=False,
                                 sum_block_bytes=2048, center_block_bytes=2048))
    np.testing.assert_allclose(np.asarray(out4_t.astype(jnp.float32)), ref4,
                               rtol=3e-2, atol=3e-2)

    print("KERNEL_OK")
</pallas_src>

<mosaic_0001>
module attributes {stable_mosaic.version = 11 : i64} {
  func.func @kernel(%arg0: i32, %arg1: memref<2xi32, #tpu.memory_space<smem>>, %arg2: memref<1x32xf32, #tpu.memory_space<vmem>>, %arg3: memref<8x64xf32, #tpu.memory_space<vmem>>, %arg4: memref<8x64xf32, #tpu.memory_space<vmem>>) attributes {dimension_semantics = [#tpu.dimension_semantics<arbitrary>], iteration_bounds = array<i64: 1>, scalar_prefetch = 1 : i64, scratch_operands = 0 : i64, tpu.core_type = #tpu.core_type<tc>, window_params = [{pipeline_mode = #tpu.pipeline_mode<synchronous>, transform_indices = @transform_0, window_bounds = array<i64: 1, 32>}, {pipeline_mode = #tpu.pipeline_mode<synchronous>, transform_indices = @transform_1, window_bounds = array<i64: 8, 64>}, {pipeline_mode = #tpu.pipeline_mode<synchronous>, transform_indices = @transform_2, window_bounds = array<i64: 8, 64>}]} {
    %0 = tpu.iota {dimensions = array<i32: 0>} : vector<8x1xi32>
    %cst = arith.constant 0.000000e+00 : f32
    %1 = vector.broadcast %cst : f32 to vector<1x32xf32>
    %c0 = arith.constant 0 : index
    %2 = memref.load %arg1[%c0] : memref<2xi32, #tpu.memory_space<smem>>
    %c0_i32 = arith.constant 0 : i32
    %c8_i32 = arith.constant 8 : i32
    %3 = arith.maxsi %c0_i32, %2 : i32
    %4 = arith.minsi %c8_i32, %3 : i32
    %c0_0 = arith.constant 0 : index
    %c0_1 = arith.constant 0 : index
    %5 = vector.load %arg3[%c0_0, %c0_1] : memref<8x64xf32, #tpu.memory_space<vmem>>, vector<8x32xf32>
    %6 = vector.broadcast %4 : i32 to vector<8x1xi32>
    %7 = arith.cmpi slt, %0, %6 : vector<8x1xi32>
    %cst_2 = arith.constant 0.000000e+00 : f32
    %8 = vector.shape_cast %7 : vector<8x1xi1> to vector<8x1xi1>
    %9 = vector.broadcast %8 : vector<8x1xi1> to vector<8x32xi1>
    %10 = vector.broadcast %cst_2 : f32 to vector<8x32xf32>
    %11 = arith.select %9, %5, %10 : vector<8x32xi1>, vector<8x32xf32>
    %cst_3 = arith.constant dense<0.000000e+00> : vector<32xf32>
    %12 = vector.multi_reduction <add>, %11, %cst_3 [0] : vector<8x32xf32> to vector<32xf32>
    %13 = vector.shape_cast %12 : vector<32xf32> to vector<1x32xf32>
    %14 = arith.addf %1, %13 : vector<1x32xf32>
    %c0_i32_4 = arith.constant 0 : i32
    %15 = arith.addi %c0_i32_4, %4 : i32
    %c1 = arith.constant 1 : index
    %16 = memref.load %arg1[%c1] : memref<2xi32, #tpu.memory_space<smem>>
    %c0_i32_5 = arith.constant 0 : i32
    %c8_i32_6 = arith.constant 8 : i32
    %17 = arith.maxsi %c0_i32_5, %16 : i32
    %18 = arith.minsi %c8_i32_6, %17 : i32
    %c0_7 = arith.constant 0 : index
    %c32 = arith.constant 32 : index
    %19 = vector.load %arg3[%c0_7, %c32] : memref<8x64xf32, #tpu.memory_space<vmem>>, vector<8x32xf32>
    %20 = vector.broadcast %18 : i32 to vector<8x1xi32>
    %21 = arith.cmpi slt, %0, %20 : vector<8x1xi32>
    %cst_8 = arith.constant 0.000000e+00 : f32
    %22 = vector.shape_cast %21 : vector<8x1xi1> to vector<8x1xi1>
    %23 = vector.broadcast %22 : vector<8x1xi1> to vector<8x32xi1>
    %24 = vector.broadcast %cst_8 : f32 to vector<8x32xf32>
    %25 = arith.select %23, %19, %24 : vector<8x32xi1>, vector<8x32xf32>
    %cst_9 = arith.constant dense<0.000000e+00> : vector<32xf32>
    %26 = vector.multi_reduction <add>, %25, %cst_9 [0] : vector<8x32xf32> to vector<32xf32>
    %27 = vector.shape_cast %26 : vector<32xf32> to vector<1x32xf32>
    %28 = arith.addf %14, %27 : vector<1x32xf32>
    %29 = arith.addi %15, %18 : i32
    %c1_i32 = arith.constant 1 : i32
    %30 = arith.maxsi %29, %c1_i32 : i32
    %31 = arith.sitofp %30 : i32 to f32
    %32 = vector.broadcast %31 : f32 to vector<1x32xf32>
    %33 = arith.divf %28, %32 : vector<1x32xf32>
    %c0_10 = arith.constant 0 : index
    %c0_11 = arith.constant 0 : index
    %34 = vector.load %arg2[%c0_10, %c0_11] : memref<1x32xf32, #tpu.memory_space<vmem>>, vector<1x32xf32>
    %35 = arith.subf %34, %33 : vector<1x32xf32>
    %c0_12 = arith.constant 0 : index
    %c0_13 = arith.constant 0 : index
    %36 = vector.load %arg3[%c0_12, %c0_13] : memref<8x64xf32, #tpu.memory_space<vmem>>, vector<8x32xf32>
    %37 = vector.broadcast %35 : vector<1x32xf32> to vector<8x32xf32>
    %38 = arith.addf %36, %37 : vector<8x32xf32>
    %c0_14 = arith.constant 0 : index
    %c0_15 = arith.constant 0 : index
    %39 = vector.load %arg4[%c0_14, %c0_15] : memref<8x64xf32, #tpu.memory_space<vmem>>, vector<8x32xf32>
    tpu.vector_store %arg4[%c0_14, %c0_15], %38 {strides = array<i32>} : memref<8x64xf32, #tpu.memory_space<vmem>>, vector<8x32xf32>,
    %c0_16 = arith.constant 0 : index
    %c32_17 = arith.constant 32 : index
    %40 = vector.load %arg3[%c0_16, %c32_17] : memref<8x64xf32, #tpu.memory_space<vmem>>, vector<8x32xf32>
    %41 = vector.broadcast %35 : vector<1x32xf32> to vector<8x32xf32>
    %42 = arith.addf %40, %41 : vector<8x32xf32>
    %c0_18 = arith.constant 0 : index
    %c32_19 = arith.constant 32 : index
    %43 = vector.load %arg4[%c0_18, %c32_19] : memref<8x64xf32, #tpu.memory_space<vmem>>, vector<8x32xf32>
    tpu.vector_store %arg4[%c0_18, %c32_19], %42 {strides = array<i32>} : memref<8x64xf32, #tpu.memory_space<vmem>>, vector<8x32xf32>,
    return
  }
  func.func @transform_0(%arg0: i32, %arg1: memref<2xi32, #tpu.memory_space<smem>>) -> (i32, i32) {
    %c0_i32 = arith.constant 0 : i32
    %c0_i32_0 = arith.constant 0 : i32
    %c0_i32_1 = arith.constant 0 : i32
    return %c0_i32, %c0_i32_0 : i32, i32
  }
  func.func @transform_1(%arg0: i32, %arg1: memref<2xi32, #tpu.memory_space<smem>>) -> (i32, i32) {
    %c0_i32 = arith.constant 0 : i32
    %c0_i32_0 = arith.constant 0 : i32
    %c0_i32_1 = arith.constant 0 : i32
    return %c0_i32, %c0_i32_0 : i32, i32
  }
  func.func @transform_2(%arg0: i32, %arg1: memref<2xi32, #tpu.memory_space<smem>>) -> (i32, i32) {
    %c0_i32 = arith.constant 0 : i32
    %c0_i32_0 = arith.constant 0 : i32
    %c0_i32_1 = arith.constant 0 : i32
    return %c0_i32, %c0_i32_0 : i32, i32
  }
}

</mosaic_0001>

<bundles_post_ra>
// kernel: tpu_custom_call.1
= control target key start
LH: loop header
LB: loop body
LE: loop exit
PB: predicated region body
PF: predicated region fallthrough
CT: control target
= control target key end

     0   :  { %s188_s12 = smov [#allocation3]   ;;  %s229_s0 = inlined_call_operand.hbm [shape: s32[2], index: 0, kind: input, shape index: {}]   ;;  %s230_s1 = inlined_call_operand.vmem [shape: f32[1,32], index: 1, kind: input, shape index: {}]   ;;  %s231_s2 = inlined_call_operand.hbm [shape: f32[8,64], index: 2, kind: input, shape index: {}]   ;;  %s232_s3 = inlined_call_operand.hbm [shape: f32[8,64], index: 3, kind: output, shape index: {}]  }
   0x1   :  { %9 = dma.hbm_to_smem %s229_s0, 16, %s188_s12, [#allocation2] }
   0x2   :  { %182 = dma.done.wait [#allocation2], 16 }
   0x3   :  { %183 = vsyncadd [#allocation2], 4294967280 }
   0x4   :  { %11 = sfence }
   0x5   :  { %12 = vsyncpa [#allocation5], 0 }
   0x6   :  { %13 = vsyncpa [#allocation6], 0  ;;  %s189_s15 = smov [#allocation4]  }
   0x7   :  { %s22_s16 = sshll.u32 %s189_s15, 4  ;;  %s23_s16 = int_to_ptr.vmem [resolvable:$true] %s22_s16 }
   0x8   :  { %s150_s17 = scalar_lea.vmem %s23_s16, 128  ;;  %p155_p1 = scmp.lt.s32.totalorder %s23_s16, %s23_s16 }
   0x9   :  { %p151_p0 = scmp.ne.s32.totalorder %s23_s16, %s150_s17  ;;  %p156_p2 = scmp.lt.s32.totalorder %s150_s17, %s150_s17 }
   0xb   :  { %p157_p3 = por %p156_p2, %p155_p1 }
   0xd   :  { %p158_p4 = pnand %p157_p3, %p151_p0 }
   0xf   :  { %161 = shalt.err (!%p158_p4)
}
  0x10   :  { %25 = dma.hbm_to_vmem [thread:$0]  %s231_s2, 128, %s23_s16, [#allocation5]  }
  0x11   :  { %184 = dma.done.wait [#allocation5], 128  }
  0x12   :  { %185 = vsyncadd [#allocation5], 4294967168  ;;  %s117_s0 = sld [smem:[#allocation3 + $0x1]]  ;;  %v29_v0 = vlaneseq  ;;  %v36_v2 = vld [vmem:[#allocation4] sm:$0xff]  ;;  %vm61_vm0 = vcmask 523520   ;;  %s190_s2 = smov 96  }
  0x13   :  { %s31_s20 = sld [smem:[#allocation3]]  ;;  %vm42_vm3 = vcmask 261120   ;;  %v81_v25 = vld [vmem:[%s230_s1] sm:$0x1]  ;;  %s191_s25 = smov 32  }
  0x14   :  { %v30_v1 = vshrl.u32 %v29_v0, 7  ;;  %s192_s26 = smov [#allocation7]  }
  0x15   :  { %s103_s27 = sshll.u32 %s192_s26, 4  ;;  %s104_s27 = int_to_ptr.vmem [resolvable:$true] %s103_s27 }
  0x16   :  { %v86_v27 = vsub.s32 0, %v30_v1  ;;  %s162_s28 = scalar_lea.vmem %s104_s27, 128  ;;  %p167_p11 = scmp.lt.s32.totalorder %s104_s27, %s104_s27 }
  0x17   :  { %p163_p10 = scmp.ne.s32.totalorder %s104_s27, %s162_s28  ;;  %p168_p12 = scmp.lt.s32.totalorder %s162_s28, %s162_s28 }
  0x18   :  { %p52_p5 = scmp.gt.s32.totalorder %s117_s0, 0  ;;  %p118_p6 = scmp.lt.s32.totalorder %s117_s0, 8 }
  0x19   :  { %p32_p7 = scmp.gt.s32.totalorder %s31_s20, 0  ;;  %p112_p8 = scmp.lt.s32.totalorder %s31_s20, 8 }
  0x1a   :  { %s234_s0 = smov (!%p52_p5, %s117_s0), 0  ;;  %p169_p13 = por %p168_p12, %p167_p11 }
  0x1b   :  { %s236_s0 = smov (!%p118_p6, %s234_s0), 8  ;;  %s238_s20 = smov (!%p32_p7, %s31_s20), 0 }
  0x1c   :  { %v56_v3 = vstv %s236_s0  ;;  %s240_s20 = smov (!%p112_p8, %s238_s20), 8  ;;  %p170_p0 = pnand %p169_p13, %p163_p10 }
  0x1d   :  { %vm57_vm1 = vcmp.lt.s32.totalorder %v30_v1, %v56_v3  ;;  %v37_v12 = vstv %s240_s20  ;;  %s74_s21 = sadd.s32 %s236_s0, %s240_s20 }
  0x1e   :  { %v60_v4 = vsel %vm57_vm1, %v36_v2, 0.0  ;;  %vm38_vm2 = vcmp.lt.s32.totalorder %v30_v1, %v37_v12  ;;  %p75_p9 = scmp.gt.s32.totalorder %s74_s21, 1 }
  0x1f   :  { %v62_v5 = vsel %vm61_vm0, %v60_v4, 0.0  ;;  %v41_v13 = vsel %vm38_vm2, %v36_v2, 0.0 }
  0x20   :  { %v63_v6 = vrot.slane %v62_v5, 4  ;;  %v43_v14 = vsel %vm42_vm3, %v41_v13, 0.0  ;;  %s242_s21 = smov (!%p75_p9, %s74_s21), 1 }
  0x21   :  { %v44_v15 = vrot.slane %v43_v14, 4  ;;  %s77_s22 = scvt.s32.f32 %s242_s21 }
  0x22   :  { %v64_v7 = vadd.f32 %v63_v6, %v62_v5 }
  0x23   :  { %v45_v16 = vadd.f32 %v44_v15, %v43_v14  ;;  %v78_v17 = vstv %s77_s22 }
  0x24   :  { %v65_v8 = vrot.slane %v64_v7, 2  ;;  %132 = vrcp.f32 %v78_v17 }
  0x25   :  { %v46_v18 = vrot.slane %v45_v16, 2 }
  0x26   :  { %v66_v9 = vadd.f32 %v65_v8, %v64_v7 }
  0x27   :  { %v47_v19 = vadd.f32 %v46_v18, %v45_v16 }
  0x28   :  { %v67_v10 = vrot.slane %v66_v9, 1 }
  0x29   :  { %v48_v20 = vrot.slane %v47_v19, 1 }
  0x2a   :  { %v68_v11 = vadd.f32 %v67_v10, %v66_v9 }
  0x2b   :  { %v49_v21 = vadd.f32 %v48_v20, %v47_v19 }
  0x2c   :  { %70 = vrot.lane.b32.xlu0 %v68_v11, %s190_s2 }
  0x31   :  { %v133_v22 = vpop.eup %132 }
  0x9e   :  { %v71_v23 = vpop.permute.xlu0 %70 }
  0x9f   :  { %v73_v24 = vadd.f32 %v71_v23, %v49_v21 }
  0xa1   :  { %v80_v26 = vmul.f32 %v133_v22, %v73_v24 }
  0xa3   :  { %v82_v28 = vsub.f32 %v81_v25, %v80_v26 }
  0xa5   :  { %v87_v29 = vrot.slane %v82_v28, %v86_v27 }
  0xa7   :  { %92 = vrot.lane.b32.xlu0 %v87_v29, %s191_s25  ;;  %v89_v30 = vadd.f32 %v87_v29, %v36_v2 }
  0xa9   :  { %90 = vst.msk [vmem:[#allocation7] sm:$0xff] %vm42_vm3, %v89_v30 }
 0x119   :  { %v93_v31 = vpop.permute.xlu0 %92 }
 0x11a   :  { %v95_v32 = vadd.f32 %v93_v31, %v36_v2 }
 0x11c   :  { %96 = vst.msk [vmem:[#allocation7] sm:$0xff] %vm61_vm0, %v95_v32 }
 0x11d   :  { %173 = shalt.err (!%p170_p0)
}
 0x11e   :  { %106 = dma.vmem_to_hbm [thread:$0]  %s104_s27, 128, %s232_s3, [#allocation6]  }
 0x11f   :  { %186 = dma.done.wait [#allocation6], 128  }
 0x120   :  { %187 = vsyncadd [#allocation6], 4294967168 }
 0x121   :  { %110 = vsyncpa [#allocation5], 1 }
 0x122   :  { %111 = vsyncpa [#allocation6], 1 }

</bundles_post_ra>
